<compile_context>
chip_gen: v6e
topology: v6e:2x2x1
jax: 0.10.0
libtpu: 0.0.40
codegen_flags: <defaults>
</compile_context>

<pallas_src>
import functools

import jax
import jax.numpy as jnp
from jax import lax
from jax.experimental import pallas as pl
from jax.experimental.pallas import tpu as pltpu


def _rel_depth_loss_kernel(depth_ref, idx_ref, rel_ref, out_ref, *, N):
    depth = depth_ref[0]            # (H, W) f32
    H, W = depth.shape
    idx = idx_ref[0]                # (2, 2N) int32: row0 = x (A then B), row1 = y
    xs = idx[0:1, :]                # (1, 2N)
    ys = idx[1:2, :]                # (1, 2N)
    rel = rel_ref[0]                # (1, N) f32 in {-1, 0, 1}

    two_n = 2 * N

    # --- exact separable gather: z[n] = depth[xs[n], ys[n]] -------------------
    # Stage 1 (MXU): cols[h, n] = depth[h, ys[n]].  Multiplying by exact {0,1}
    # at HIGHEST precision keeps full f32 accuracy; MXU flops are tiny here.
    iota_w = lax.broadcasted_iota(jnp.int32, (W, two_n), 0)
    oh_y = (iota_w == ys).astype(jnp.float32)                 # (W, 2N)
    cols = jnp.dot(depth, oh_y,
                   preferred_element_type=jnp.float32,
                   precision=lax.Precision.HIGHEST)           # (H, 2N)

    # Stage 2 (VPU + XLU): pick row xs[n] from column n via mask + reduce.
    iota_h = lax.broadcasted_iota(jnp.int32, (H, two_n), 0)
    oh_x = (iota_h == xs).astype(jnp.float32)                 # (H, 2N)
    z = jnp.sum(cols * oh_x, axis=0, keepdims=True)           # (1, 2N)

    z_a = z[:, :N]                                            # (1, N)
    z_b = z[:, N:]                                            # (1, N)
    pred = z_a - z_b                                          # (1, N)

    # --- masked ranking loss ---------------------------------------------------
    nz = rel != 0.0
    cnt_nz = jnp.sum(nz.astype(jnp.float32))
    cnt_z = jnp.float32(N) - cnt_nz

    # Stable softplus: log(1 + exp(-t)) = max(-t, 0) + log(1 + exp(-|t|))
    neg_t = -rel * pred
    softplus = jnp.maximum(neg_t, 0.0) + jnp.log(1.0 + jnp.exp(-jnp.abs(neg_t)))

    log_loss = jnp.sum(jnp.where(nz, softplus, 0.0)) / jnp.maximum(cnt_nz, 1.0)
    sq_loss = jnp.sum(jnp.where(nz, 0.0, pred * pred)) / jnp.maximum(cnt_z, 1.0)

    loss = log_loss + sq_loss
    # Lane-dense per-batch output row; wrapper reads column 0.
    out_ref[...] = jnp.full(out_ref.shape, loss, dtype=out_ref.dtype)


def relative_depth_loss(output, x_A, y_A, x_B, y_B, ordinal_relation):
    """Pallas equivalent of RelativeDepthLoss()(output, target)."""
    B, C, H, W = output.shape
    assert C == 1, "RelativeDepthLoss indexes output[index][0] (single channel)"
    N = x_A.shape[-1]

    depth = output[:, 0].astype(jnp.float32)                           # (B, H, W)
    xs = jnp.concatenate([x_A, x_B], axis=-1).astype(jnp.int32)        # (B, 2N)
    ys = jnp.concatenate([y_A, y_B], axis=-1).astype(jnp.int32)        # (B, 2N)
    idx = jnp.stack([xs, ys], axis=1)                                  # (B, 2, 2N)
    rel = ordinal_relation.reshape(B, 1, N).astype(jnp.float32)        # (B, 1, N)

    per_batch = pl.pallas_call(
        functools.partial(_rel_depth_loss_kernel, N=N),
        out_shape=jax.ShapeDtypeStruct((B, 1, 128), jnp.float32),
        grid_spec=pltpu.PrefetchScalarGridSpec(
            num_scalar_prefetch=0,
            grid=(B,),
            in_specs=[
                pl.BlockSpec((1, H, W), lambda b: (b, 0, 0)),
                pl.BlockSpec((1, 2, 2 * N), lambda b: (b, 0, 0)),
                pl.BlockSpec((1, 1, N), lambda b: (b, 0, 0)),
            ],
            out_specs=pl.BlockSpec((1, 1, 128), lambda b: (b, 0, 0)),
        ),
        compiler_params=pltpu.CompilerParams(
            dimension_semantics=("parallel",),
            vmem_limit_bytes=64 * 1024 * 1024,
        ),
    )(depth, idx, rel)

    return jnp.sum(per_batch[:, 0, 0]) / B


def _reference_loss(output, x_A, y_A, x_B, y_B, rel):
    """Pure-JAX mirror of the PyTorch forward (for verification)."""
    B = output.shape[0]
    total = jnp.float32(0.0)
    for i in range(B):
        d = output[i, 0]
        z_a = d[x_A[i], y_A[i]]
        z_b = d[x_B[i], y_B[i]]
        r = rel[i].astype(jnp.float32)
        pred = z_a - z_b
        nz = r != 0
        log_loss = (jnp.sum(jnp.where(nz, jnp.log(1.0 + jnp.exp(-r * pred)), 0.0))
                    / jnp.sum(nz))
        sq_loss = jnp.sum(jnp.where(nz, 0.0, pred ** 2)) / jnp.sum(~nz)
        total = total + log_loss + sq_loss
    return total / B


if __name__ == "__main__":
    # Small deterministic inputs (RelativeDepthLoss has no learnable params).
    B, H, W, N = 2, 16, 16, 8
    key = jax.random.PRNGKey(0)
    k_out, k_xa, k_ya, k_xb, k_yb, k_rel = jax.random.split(key, 6)

    output = jax.random.normal(k_out, (B, 1, H, W), dtype=jnp.float32)
    x_A = jax.random.randint(k_xa, (B, N), 0, H, dtype=jnp.int32)
    y_A = jax.random.randint(k_ya, (B, N), 0, W, dtype=jnp.int32)
    x_B = jax.random.randint(k_xb, (B, N), 0, H, dtype=jnp.int32)
    y_B = jax.random.randint(k_yb, (B, N), 0, W, dtype=jnp.int32)
    # ordinal relations in {-1, 0, 1}; force at least one zero and one nonzero
    # per batch so both masked means are well-defined (as PyTorch assumes).
    rel = jax.random.randint(k_rel, (B, N), -1, 2, dtype=jnp.int32)
    rel = rel.at[:, 0].set(0).at[:, 1].set(1)
    rel = rel.astype(jnp.float32)

    loss = relative_depth_loss(output, x_A, y_A, x_B, y_B, rel)
    loss = jax.block_until_ready(loss)

    ref = jax.block_until_ready(_reference_loss(output, x_A, y_A, x_B, y_B, rel))
    assert jnp.allclose(loss, ref, rtol=1e-5, atol=1e-5), (loss, ref)

    print("KERNEL_OK")
</pallas_src>

<mosaic_0001>
module attributes {stable_mosaic.version = 11 : i64} {
  func.func @_rel_depth_loss_kernel(%arg0: i32, %arg1: memref<1x16x16xf32, #tpu.memory_space<vmem>>, %arg2: memref<1x2x16xi32, #tpu.memory_space<vmem>>, %arg3: memref<1x1x8xf32, #tpu.memory_space<vmem>>, %arg4: memref<1x1x128xf32, #tpu.memory_space<vmem>>) attributes {dimension_semantics = [#tpu.dimension_semantics<parallel>], iteration_bounds = array<i64: 2>, scalar_prefetch = 0 : i64, scratch_operands = 0 : i64, tpu.core_type = #tpu.core_type<tc>, window_params = [{transform_indices = @transform_0, window_bounds = array<i64: 1, 16, 16>}, {transform_indices = @transform_1, window_bounds = array<i64: 1, 2, 16>}, {transform_indices = @transform_2, window_bounds = array<i64: 1, 1, 8>}, {transform_indices = @transform_3, window_bounds = array<i64: 1, 1, 128>}]} {
    %c0 = arith.constant 0 : index
    %c0_0 = arith.constant 0 : index
    %c0_1 = arith.constant 0 : index
    %0 = vector.load %arg1[%c0, %c0_0, %c0_1] : memref<1x16x16xf32, #tpu.memory_space<vmem>>, vector<1x16x16xf32>
    %1 = vector.shape_cast %0 : vector<1x16x16xf32> to vector<16x16xf32>
    %c0_2 = arith.constant 0 : index
    %c0_3 = arith.constant 0 : index
    %c0_4 = arith.constant 0 : index
    %2 = vector.load %arg2[%c0_2, %c0_3, %c0_4] : memref<1x2x16xi32, #tpu.memory_space<vmem>>, vector<1x2x16xi32>
    %3 = vector.shape_cast %2 : vector<1x2x16xi32> to vector<2x16xi32>
    %4 = vector.extract_strided_slice %3 {offsets = [0, 0], sizes = [1, 16], strides = [1, 1]} : vector<2x16xi32> to vector<1x16xi32>
    %5 = vector.extract_strided_slice %3 {offsets = [1, 0], sizes = [1, 16], strides = [1, 1]} : vector<2x16xi32> to vector<1x16xi32>
    %c0_5 = arith.constant 0 : index
    %c0_6 = arith.constant 0 : index
    %c0_7 = arith.constant 0 : index
    %6 = vector.load %arg3[%c0_5, %c0_6, %c0_7] : memref<1x1x8xf32, #tpu.memory_space<vmem>>, vector<1x1x8xf32>
    %7 = vector.shape_cast %6 : vector<1x1x8xf32> to vector<1x8xf32>
    %8 = tpu.iota {dimensions = array<i32: 0>} : vector<16x16xi32>
    %9 = vector.broadcast %5 : vector<1x16xi32> to vector<16x16xi32>
    %10 = arith.cmpi eq, %8, %9 : vector<16x16xi32>
    %11 = arith.extui %10 : vector<16x16xi1> to vector<16x16xi32>
    %12 = arith.sitofp %11 : vector<16x16xi32> to vector<16x16xf32>
    %cst = arith.constant dense<0.000000e+00> : vector<16x16xf32>
    %13 = tpu.matmul %1, %12, %cst {dimension_numbers = #tpu.dot_dimension_numbers<[1], [0], [0], [1], [0, 0, 1, 1], [], []>, precision = #tpu.contract_precision<fp32>} : vector<16x16xf32>, vector<16x16xf32>, vector<16x16xf32> -> vector<16x16xf32>
    %14 = tpu.iota {dimensions = array<i32: 0>} : vector<16x16xi32>
    %15 = vector.broadcast %4 : vector<1x16xi32> to vector<16x16xi32>
    %16 = arith.cmpi eq, %14, %15 : vector<16x16xi32>
    %17 = arith.extui %16 : vector<16x16xi1> to vector<16x16xi32>
    %18 = arith.sitofp %17 : vector<16x16xi32> to vector<16x16xf32>
    %19 = arith.mulf %13, %18 : vector<16x16xf32>
    %cst_8 = arith.constant dense<0.000000e+00> : vector<16xf32>
    %20 = vector.multi_reduction <add>, %19, %cst_8 [0] : vector<16x16xf32> to vector<16xf32>
    %21 = vector.shape_cast %20 : vector<16xf32> to vector<1x16xf32>
    %22 = vector.extract_strided_slice %21 {offsets = [0, 0], sizes = [1, 8], strides = [1, 1]} : vector<1x16xf32> to vector<1x8xf32>
    %23 = vector.extract_strided_slice %21 {offsets = [0, 8], sizes = [1, 8], strides = [1, 1]} : vector<1x16xf32> to vector<1x8xf32>
    %24 = arith.subf %22, %23 : vector<1x8xf32>
    %cst_9 = arith.constant 0.000000e+00 : f32
    %25 = vector.broadcast %cst_9 : f32 to vector<1x8xf32>
    %26 = arith.cmpf one, %7, %25 : vector<1x8xf32>
    %27 = arith.extui %26 : vector<1x8xi1> to vector<1x8xi32>
    %28 = arith.sitofp %27 : vector<1x8xi32> to vector<1x8xf32>
    %29 = vector.shape_cast %28 : vector<1x8xf32> to vector<1x1x8xf32>
    %cst_10 = arith.constant dense<0.000000e+00> : vector<1xf32>
    %30 = vector.multi_reduction <add>, %29, %cst_10 [1, 2] : vector<1x1x8xf32> to vector<1xf32>
    %31 = vector.shape_cast %30 : vector<1xf32> to vector<1x1x1xf32>
    %32 = vector.extract %31[0, 0, 0] : f32 from vector<1x1x1xf32>
    %cst_11 = arith.constant 8.000000e+00 : f32
    %33 = arith.subf %cst_11, %32 : f32
    %cst_12 = arith.constant 0.000000e+00 : f32
    %34 = vector.broadcast %cst_12 : f32 to vector<1x8xf32>
    %35 = arith.subf %34, %7 : vector<1x8xf32>
    %36 = arith.mulf %35, %24 : vector<1x8xf32>
    %cst_13 = arith.constant 0.000000e+00 : f32
    %37 = vector.broadcast %cst_13 : f32 to vector<1x8xf32>
    %38 = arith.maximumf %36, %37 : vector<1x8xf32>
    %39 = math.absf %36 : vector<1x8xf32>
    %cst_14 = arith.constant 0.000000e+00 : f32
    %40 = vector.broadcast %cst_14 : f32 to vector<1x8xf32>
    %41 = arith.subf %40, %39 : vector<1x8xf32>
    %42 = math.exp %41 : vector<1x8xf32>
    %cst_15 = arith.constant 1.000000e+00 : f32
    %43 = vector.broadcast %cst_15 : f32 to vector<1x8xf32>
    %44 = arith.addf %43, %42 : vector<1x8xf32>
    %45 = math.log %44 : vector<1x8xf32>
    %46 = arith.addf %38, %45 : vector<1x8xf32>
    %cst_16 = arith.constant 0.000000e+00 : f32
    %47 = vector.broadcast %cst_16 : f32 to vector<1x8xf32>
    %48 = arith.select %26, %46, %47 : vector<1x8xi1>, vector<1x8xf32>
    %49 = vector.shape_cast %48 : vector<1x8xf32> to vector<1x1x8xf32>
    %cst_17 = arith.constant dense<0.000000e+00> : vector<1xf32>
    %50 = vector.multi_reduction <add>, %49, %cst_17 [1, 2] : vector<1x1x8xf32> to vector<1xf32>
    %51 = vector.shape_cast %50 : vector<1xf32> to vector<1x1x1xf32>
    %52 = vector.extract %51[0, 0, 0] : f32 from vector<1x1x1xf32>
    %cst_18 = arith.constant 1.000000e+00 : f32
    %53 = arith.maximumf %32, %cst_18 : f32
    %54 = arith.divf %52, %53 : f32
    %55 = arith.mulf %24, %24 : vector<1x8xf32>
    %cst_19 = arith.constant 0.000000e+00 : f32
    %56 = vector.broadcast %cst_19 : f32 to vector<1x8xf32>
    %57 = arith.select %26, %56, %55 : vector<1x8xi1>, vector<1x8xf32>
    %58 = vector.shape_cast %57 : vector<1x8xf32> to vector<1x1x8xf32>
    %cst_20 = arith.constant dense<0.000000e+00> : vector<1xf32>
    %59 = vector.multi_reduction <add>, %58, %cst_20 [1, 2] : vector<1x1x8xf32> to vector<1xf32>
    %60 = vector.shape_cast %59 : vector<1xf32> to vector<1x1x1xf32>
    %61 = vector.extract %60[0, 0, 0] : f32 from vector<1x1x1xf32>
    %cst_21 = arith.constant 1.000000e+00 : f32
    %62 = arith.maximumf %33, %cst_21 : f32
    %63 = arith.divf %61, %62 : f32
    %64 = arith.addf %54, %63 : f32
    %65 = vector.broadcast %64 : f32 to vector<1x1x128xf32>
    %c0_22 = arith.constant 0 : index
    %c0_23 = arith.constant 0 : index
    %c0_24 = arith.constant 0 : index
    %66 = vector.load %arg4[%c0_22, %c0_23, %c0_24] : memref<1x1x128xf32, #tpu.memory_space<vmem>>, vector<1x1x128xf32>
    tpu.vector_store %arg4[%c0_22, %c0_23, %c0_24], %65 {strides = array<i32>} : memref<1x1x128xf32, #tpu.memory_space<vmem>>, vector<1x1x128xf32>,
    return
  }
  func.func @transform_0(%arg0: i32) -> (i32, i32, i32) {
    %c0_i32 = arith.constant 0 : i32
    %c0_i32_0 = arith.constant 0 : i32
    %c0_i32_1 = arith.constant 0 : i32
    return %arg0, %c0_i32, %c0_i32_0 : i32, i32, i32
  }
  func.func @transform_1(%arg0: i32) -> (i32, i32, i32) {
    %c0_i32 = arith.constant 0 : i32
    %c0_i32_0 = arith.constant 0 : i32
    %c0_i32_1 = arith.constant 0 : i32
    return %arg0, %c0_i32, %c0_i32_0 : i32, i32, i32
  }
  func.func @transform_2(%arg0: i32) -> (i32, i32, i32) {
    %c0_i32 = arith.constant 0 : i32
    %c0_i32_0 = arith.constant 0 : i32
    %c0_i32_1 = arith.constant 0 : i32
    return %arg0, %c0_i32, %c0_i32_0 : i32, i32, i32
  }
  func.func @transform_3(%arg0: i32) -> (i32, i32, i32) {
    %c0_i32 = arith.constant 0 : i32
    %c0_i32_0 = arith.constant 0 : i32
    %c0_i32_1 = arith.constant 0 : i32
    return %arg0, %c0_i32, %c0_i32_0 : i32, i32, i32
  }
}

</mosaic_0001>

<bundles_post_ra>
// kernel: tpu_custom_call.1
= control target key start
LH: loop header
LB: loop body
LE: loop exit
PB: predicated region body
PF: predicated region fallthrough
CT: control target
= control target key end

     0   :  { %8 = vsyncpa [#allocation3], 0  ;;  %s1545_s0 = inlined_call_operand.hbm [shape: f32[2,16,16], index: 0, kind: input, shape index: {}]   ;;  %s1546_s1 = inlined_call_operand.hbm [shape: s32[2,2,16], index: 1, kind: input, shape index: {}]   ;;  %s1547_s2 = inlined_call_operand.vmem [shape: f32[2,1,8], index: 2, kind: input, shape index: {}]   ;;  %s1548_s3 = inlined_call_operand.hbm [shape: f32[2,1,128], index: 3, kind: output, shape index: {}]  }
   0x1   :  { %10 = vsyncpa [#allocation3 + $0x1], 0 }
   0x2   :  { %11 = vsyncpa [#allocation6], 0 }
   0x3   :  { %13 = vsyncpa [#allocation6 + $0x1], 0 }
   0x4   :  { %14 = vsyncpa [#allocation4], 0 }
   0x5   :  { %16 = vsyncpa [#allocation4 + $0x1], 0  ;;  %s1286_s12 = smov 0   ;;  %s1288_s13 = smov 0  }
   0x6   :  { %s1290_s14 = smov 0   ;;  %s1292_s15 = smov 0  }
   0x7 LB: > { %s1307_s16 = sadd.s32 4294967295, %s1255_s15   ;;  %s964_s17 = sadd.s32 4294967294, %s1255_s15   ;;  %s1255_s15 = sphi %s1292_s15, %s1569_s15   ;;  %s1251_s14 = sphi %s1290_s14, %s1568_s14   ;;  %s1247_s13 = sphi %s1288_s13, %s1567_s13   ;;  %s1243_s12 = sphi %s1286_s12, %s1566_s12  }
   0x8   : > { %s1311_s18 = sadd.s32 1, %s1255_s15   ;;  %s29_s19 = sadd.s32 1, %s1251_s14 }
   0x9   : > { %s26_s20 = ssub.s32 %s1255_s15, %s1311_s18  ;;  %p36_p0 = scmp.ne.s32.totalorder %s1251_s14, %s1247_s13 }
   0xa   : > { %p27_p1 = scmp.eq.s32.totalorder %s26_s20, 0  ;;  %p37_p2 = scmp.eq.s32.totalorder %s1255_s15, 0 }
   0xb   : > { %p42_p3 = scmp.ne.s32.totalorder %s1247_s13, %s1243_s12  ;;  %p43_p4 = scmp.eq.s32.totalorder %s1307_s16, 0 }
   0xc   : > { %s1323_s21 = scalar_select %p27_p1, %s1251_s14, %s29_s19  }
   0xd   : > { %p1325_p5 = por %p37_p2, %p36_p0  ;;  %p1329_p6 = por %p43_p4, %p42_p3 }
   0xe   : > { %p118_p7 = scmp.eq.s32.totalorder %s1307_s16, 1  ;;  %p124_p8 = scmp.eq.s32.totalorder %s964_s17, 1 }
   0xf   : > { %s1552_s23 = scalar_select %p1329_p6, 1, 0 }
  0x10   : > { %p1083_p10 = scmp.lt.s32.totalorder %s1255_s15, 2  ;;  %p1336_p11 = por %p118_p7, %p36_p0 }
  0x11   : > { %p1340_p12 = por %p124_p8, %p42_p3  ;;  %s1345_s26 = sand.u32 1, %s1251_s14  }
  0x12   : > { %s1553_s24 = scalar_select %p1336_p11, 1, 0 }
  0x13   : > { %s1554_s25 = scalar_select %p1340_p12, 1, 0 }
  0x14   : > { %s989_s27 = sshll.u32 %s1255_s15, 8  ;;  %s967_s28 = sshll.u32 %s1345_s26, 4 }
  0x15   : > { %s1352_s4 = scalar_lea.hbm %s1545_s0, %s989_s27  ;;  %s148_s5 = scalar_lea.vmem [#allocation2], %s967_s28 }
  0x16   : > { %s155_s6 = sshll.u32 %s148_s5, 4  ;;  %p1356_p13 = pnand %p1083_p10, %p1325_p5  ;;  %s1360_s6 = int_to_ptr.vmem [resolvable:$true] %s155_s6 }
  0x17   : > { %s145_s8 = scalar_lea.sflag [#allocation3], %s1345_s26  ;;  %s1131_s9 = scalar_lea.hbm %s1352_s4, 256 }
  0x18   : > { %p1132_p0 = scmp.ne.s32.totalorder %s1352_s4, %s1131_s9  ;;  %p1133_p1 = pneg %p1356_p13 }
  0x19   : > { %s1136_s17 = scalar_lea.hbm %s1545_s0, 512  ;;  %p1137_p4 = scmp.lt.s32.totalorder %s1352_s4, %s1545_s0 }
  0x1a   : > { %p1134_p2 = pnand %p1133_p1, %p1132_p0  ;;  %p1138_p5 = scmp.lt.s32.totalorder %s1136_s17, %s1131_s9 }
  0x1c   : > { %p1135_p3 = pneg %p1134_p2  ;;  %p1139_p7 = por %p1138_p5, %p1137_p4 }
  0x1e   : > { %p1140_p8 = pnand %p1139_p7, %p1135_p3 }
  0x20   : > { %1143 = shalt.err (!%p1140_p8)
}
  0x21   : > { %s1144_s22 = scalar_lea.vmem %s1360_s6, 256  ;;  %s1257_s27 = smov [#allocation2]  }
  0x22   : > { %p1145_p10 = scmp.ne.s32.totalorder %s1360_s6, %s1144_s22  ;;  %s1149_s28 = sshll.u32 %s1257_s27, 4  ;;  %s1150_s28 = int_to_ptr.vmem [resolvable:$false] %s1149_s28 }
  0x23   : > { %s1151_s29 = scalar_lea.vmem %s1150_s28, 512  ;;  %p1152_p9 = scmp.lt.s32.totalorder %s1360_s6, %s1150_s28 }
  0x24   : > { %p1147_p0 = pnand %p1145_p10, %p1133_p1  ;;  %p1153_p12 = scmp.lt.s32.totalorder %s1151_s29, %s1144_s22 }
  0x26   : > { %p1148_p2 = pneg %p1147_p0  ;;  %p1154_p11 = por %p1153_p12, %p1152_p9 }
  0x28   : > { %p1155_p4 = pnand %p1154_p11, %p1148_p2 }
  0x2a   : > { %1158 = shalt.err (!%p1155_p4)
}
  0x2b   : > { %s1258_s30 = smov 128   ;;  %s1259_s5 = smov 8  }
  0x2c   : > { %1075 = dma.hbm_to_vmem [thread:$0]  (!%p1356_p13), %s1352_s4, 256, %s1360_s6, %s145_s8, %s1258_s30, %s1258_s30, %s1259_s5  }
  0x2d   : > { %p972_p3 = scmp.ge.s32.totalorder %s1255_s15, 1  ;;  %p187_p5 = scmp.lt.s32.totalorder %s1255_s15, 3 }
  0x2e   : > { %s970_s9 = sshll.u32 %s1345_s26, 1  ;;  %s971_s11 = sshll.u32 %s1255_s15, 5 }
  0x2f   : > { %p1392_p9 = pnand %p972_p3, %p187_p5  ;;  %s169_s17 = scalar_lea.vmem [#allocation5], %s970_s9 }
  0x30   : > { %s176_s19 = sshll.u32 %s169_s17, 4  ;;  %s174_s27 = scalar_lea.hbm %s1546_s1, %s971_s11  ;;  %s177_s19 = int_to_ptr.vmem [resolvable:$true] %s176_s19 }
  0x31   : > { %s1556_s10 = scalar_select %p1392_p9, 1, 0 }
  0x32   : > { %s166_s28 = scalar_lea.sflag [#allocation6], %s1345_s26  ;;  %s1159_s29 = scalar_lea.hbm %s174_s27, 32 }
  0x33   : > { %p1160_p11 = scmp.ne.s32.totalorder %s174_s27, %s1159_s29  ;;  %s1164_s8 = scalar_lea.hbm %s1546_s1, 64 }
  0x34   : > { %p1165_p8 = scmp.lt.s32.totalorder %s174_s27, %s1546_s1  ;;  %p1166_p10 = scmp.lt.s32.totalorder %s1164_s8, %s1159_s29 }
  0x35   : > { %p1162_p12 = pnand %p1160_p11, %p1133_p1 }
  0x36   : > { %p1167_p0 = por %p1166_p10, %p1165_p8 }
  0x37   : > { %p1163_p7 = pneg %p1162_p12 }
  0x39   : > { %p1168_p2 = pnand %p1167_p0, %p1163_p7 }
  0x3b   : > { %1171 = shalt.err (!%p1168_p2)
}
  0x3c   : > { %s1172_s9 = scalar_lea.vmem %s177_s19, 32  ;;  %s1260_s26 = smov [#allocation5]  }
  0x3d   : > { %p1173_p4 = scmp.ne.s32.totalorder %s177_s19, %s1172_s9  ;;  %s1177_s11 = sshll.u32 %s1260_s26, 4  ;;  %s1178_s11 = int_to_ptr.vmem [resolvable:$false] %s1177_s11 }
  0x3e   : > { %s1179_s17 = scalar_lea.vmem %s1178_s11, 64  ;;  %p1180_p11 = scmp.lt.s32.totalorder %s177_s19, %s1178_s11 }
  0x3f   : > { %p1175_p3 = pnand %p1173_p4, %p1133_p1  ;;  %p1181_p12 = scmp.lt.s32.totalorder %s1179_s17, %s1172_s9 }
  0x41   : > { %p1176_p5 = pneg %p1175_p3  ;;  %p1182_p6 = por %p1181_p12, %p1180_p11 }
  0x43   : > { %p1183_p9 = pnand %p1182_p6, %p1176_p5 }
  0x45   : > { %1186 = shalt.err (!%p1183_p9)
}
  0x46   : > { %1078 = dma.hbm_to_vmem [thread:$0]  (!%p1356_p13), %s174_s27, 32, %s177_s19, %s166_s28  }
  0x47   : > { %p1557_p7 = scmp.ne.s32.totalorder %s1556_s10, 0 }
  0x48   : > { %s1418_s20 = sand.u32 (!%p1557_p7), 1, %s1247_s13   ;;  %p1558_p1 = scmp.ne.s32.totalorder (!%p1557_p7), %s1552_s23, 0 }
  0x49   : > { %191 = sbr.rel (%p1557_p7) target bundleno = 710 (0x2c6), region = 32  ;;  %s973_s22 = sshll.u32 (!%p1557_p7), %s1418_s20, 4 }
  0x4a   : > { %s194_s29 = scalar_lea.sflag (!%p1557_p7), [#allocation3], %s1418_s20  ;;  %s197_s4 = scalar_lea.vmem (!%p1557_p7), [#allocation2], %s973_s22 }
  0x4e   : > { %1230 = dma.done.wait (%p1558_p1), %s194_s29, 256  }
  0x4f   : > { %1232 = vsyncadd (%p1558_p1), %s194_s29, 4294967040  ;;  %s974_s7 = sshll.u32 %s1418_s20, 1  ;;  %s203_s10 = scalar_lea.sflag [#allocation6], %s1418_s20 }
  0x50   : > { %s206_s19 = scalar_lea.vmem [#allocation5], %s974_s7 }
  0x51   : > { %1234 = dma.done.wait (%p1558_p1), %s203_s10, 32  }
  0x52   : > { %1236 = vsyncadd (%p1558_p1), %s203_s10, 4294967264  ;;  %v243_v0 = vlaneseq  ;;  %vm256_vm0 = vcmask 130048   ;;  %v1438_v4 = vld [vmem:[%s206_s19] sm:$0x3]  ;;  %v240_v6 = vld [vmem:[%s197_s4 + $0x8] sm:$0xff]  ;;  %v1261_v14 = vmov 1.0  }
  0x53   : > { %v239_v5 = vld [vmem:[%s197_s4] sm:$0xff]  ;;  %v261_v9 = vsel %vm256_vm0, %v240_v6, 0  ;;  %v1262_v16 = vmov 0.0   ;;  %s1263_s23 = smov 120   ;;  %p236_p6 = scmp.lt.s32.totalorder %s1307_s16, 1  ;;  %vm794_vm6 = vcmask 57344  }
  0x54   : > { %v1432_v1 = vshrl.u32 %v243_v0, 7  ;;  %v258_v8 = vsel %vm256_vm0, %v239_v5, 0  ;;  %v340_v11 = vand.u32 4294901760, %v261_v9  ;;  %s1264_s9 = smov 1.0   ;;  %s986_s4 = sshll.u32 %s1307_s16, 4 }
  0x55   : > { %v330_v10 = vand.u32 4294901760, %v258_v8  ;;  %s237_s27 = scalar_select %p236_p6, %s1307_s16, 1 }
  0x56   : > { %v248_v2 = vsub.s32 1, %v1432_v1  ;;  %v1436_v3 = vadd.s32 8, %v1432_v1  ;;  %v341_v18 = vsub.f32 %v261_v9, %v340_v11  ;;  %v767_v37 = vsub.s32 0, %v1432_v1  ;;  %p1563_p9 = scmp.ne.s32.totalorder %s1553_s24, 0  ;;  %s1265_s16 = smov [#allocation7]  }
  0x57   : > { %v331_v15 = vsub.f32 %v258_v8, %v330_v10  ;;  %1025 = vmatprep.mubr.f32.mxu1 %v330_v10  ;;  %s238_s8 = scalar_lea.vmem %s1547_s2, %s237_s27 }
  0x58   : > { %v249_v7 = vrot.slane %v1438_v4, %v248_v2  ;;  %v342_v23 = vand.u32 4294901760, %v341_v18  ;;  %v768_v44 = vrot.slane %v1438_v4, %v767_v37 }
  0x59   : > { %v332_v22 = vand.u32 4294901760, %v331_v15 }
  0x5a   : > { %vm1444_vm1 = vcmp.eq.s32.totalorder %v1436_v3, %v249_v7  ;;  %vm1449_vm2 = vcmp.eq.s32.totalorder %v1432_v1, %v249_v7  ;;  %v343_v27 = vsub.f32 %v341_v18, %v342_v23  ;;  %vm770_vm3 = vcmp.eq.s32.totalorder %v1436_v3, %v768_v44  ;;  %v242_v7 = vld [vmem:[%s238_s8] sm:$0x1] }
  0x5b   : > { %1014 = vmatprep.subr.msk.mxu0 %vm1444_vm1, %v1261_v14  ;;  %v976_v17 = vsel %vm1444_vm1, 1.0, %v1262_v16  ;;  %v975_v19 = vsel %vm1449_vm2, 1.0, %v1262_v16  ;;  %v333_v26 = vsub.f32 %v331_v15, %v332_v22  ;;  %vm769_vm4 = vcmp.eq.s32.totalorder %v1432_v1, %v768_v44 }
  0x5c   : > { %1015 = vmatpush3.msk.msra.mxu0 %vm1444_vm1, %v1261_v14  ;;  %v380_v20 = vsub.f32 %v976_v17, %v976_v17  ;;  %v387_v21 = vsub.f32 %v975_v19, %v975_v19  ;;  %v344_v31 = vand.u32 4294901760, %v343_v27  ;;  %v984_v55 = vsel %vm770_vm3, 1.0, %v1262_v16 }
  0x5d   : > { %1016 = vmatprep.subr.msk.mxu0 %vm1449_vm2, %v1261_v14  ;;  %v334_v30 = vand.u32 4294901760, %v333_v26  ;;  %v983_v58 = vsel %vm769_vm4, 1.0, %v1262_v16  ;;  %vm791_vm5 = vcmp.ne.f32.partialorder %v242_v7, 0.0 }
  0x5e   : > { %1017 = vmatpush3.msk.msra.mxu0 %vm1449_vm2, %v1261_v14  ;;  %v381_v24 = vand.u32 4294901760, %v380_v20  ;;  %v388_v25 = vand.u32 4294901760, %v387_v21  ;;  %v985_v8 = vsel %vm791_vm5, 1.0, %v1262_v16 }
  0x5f   : > { %1028 = vmatprep.subr.mxu0 %v380_v20  ;;  %1018 = vmatprep.mubr.f32.mxu0 %v334_v30  ;;  %v795_v9 = vsel %vm794_vm6, %v985_v8, 0.0 }
  0x60   : > { %v382_v28 = vsub.f32 %v380_v20, %v381_v24  ;;  %v389_v29 = vsub.f32 %v387_v21, %v388_v25  ;;  %1019 = vmatmul.mubr.f32.vlgmr.msra.gmra.mxu0 %v344_v31 }
  0x61   : > { %1029 = vmatpush3.msra.mxu0 %v380_v20  ;;  %1032 = vmatprep.mubr.f32.mxu0 %v331_v15 }
  0x62   : > { %v383_v32 = vand.u32 4294901760, %v382_v28  ;;  %v390_v33 = vand.u32 4294901760, %v389_v29  ;;  %1030 = vmatprep.subr.mxu0 %v387_v21 }
  0x63   : > { %1031 = vmatpush3.msra.mxu0 %v387_v21 }
  0x64   : > { %1021 = vmatprep.subr.mxu1 %v383_v32  ;;  %1033 = vmatmul.mubr.f32.vlgmr.msra.gmra.mxu0 %v341_v18 }
  0x65   : > { %1022 = vmatpush3.msra.mxu1 %v383_v32  ;;  %1042 = vmatprep.subr.mxu0 %v381_v24 }
  0x66   : > { %1023 = vmatprep.subr.mxu1 %v390_v33  ;;  %1043 = vmatpush3.msra.mxu0 %v381_v24 }
  0x67   : > { %1024 = vmatpush3.msra.mxu1 %v390_v33  ;;  %1044 = vmatprep.subr.mxu0 %v388_v25 }
  0x68   : > { %1026 = vmatmul.mubr.f32.vlgmr.msra.gmra.mxu1 %v340_v11  ;;  %1035 = vmatprep.subr.msk.mxu1 %vm1444_vm1, %v1261_v14 }
  0x69   : > { %1036 = vmatpush3.msk.msra.mxu1 %vm1444_vm1, %v1261_v14  ;;  %1039 = vmatprep.mubr.f32.mxu1 %v332_v22 }
  0x6a   : > { %1037 = vmatprep.subr.msk.mxu1 %vm1449_vm2, %v1261_v14  ;;  %1045 = vmatpush3.msra.mxu0 %v388_v25 }
  0x6b   : > { %1038 = vmatpush3.msk.msra.mxu1 %vm1449_vm2, %v1261_v14  ;;  %1046 = vmatprep.mubr.f32.mxu0 %v330_v10 }
  0x6c   : > { %1040 = vmatmul.mubr.f32.vlgmr.msra.gmra.mxu1 %v342_v23  ;;  %1049 = vmatprep.subr.msk.mxu1 %vm1444_vm1, %v1261_v14 }
  0x6d   : > { %1047 = vmatmul.mubr.f32.vlgmr.msra.gmra.mxu0 %v340_v11  ;;  %1050 = vmatpush3.msk.msra.mxu1 %vm1444_vm1, %v1261_v14 }
  0x6e   : > { %1053 = vmatprep.mubr.f32.mxu1 %v330_v10  ;;  %1051 = vmatprep.subr.msk.mxu1 %vm1449_vm2, %v1261_v14  ;;  %v806_v10 = vsub.f32 0.0, %v242_v7 }
  0x6f   : > { %1052 = vmatpush3.msk.msra.mxu1 %vm1449_vm2, %v1261_v14 }
  0x70   : > { %1054 = vmatmul.mubr.f32.vlgmr.msra.gmra.mxu1 %v340_v11 }
 0x120   : > { %v1020_v34 = vpop.f32.mrf.mxu0 }
 0x122   : > { %v336_v35 = vpop.f32.mrf.mxu0 }
 0x124   : > { %v1034_v39 = vpop.f32.mrf.mxu0 }
 0x126   : > { %v509_v43 = vpop.f32.mrf.mxu0 }
 0x128   : > { %v1027_v36 = vpop.f32.mrf.mxu1 }
 0x129   : > { %v434_v38 = vadd.f32 %v1027_v36, %v1020_v34 }
 0x12a   : > { %v427_v40 = vpop.f32.mrf.mxu1 }
 0x12b   : > { %v517_v41 = vadd.f32 %v1034_v39, %v434_v38  ;;  %v428_v42 = vadd.f32 %v427_v40, %v336_v35 }
 0x12c   : > { %v1041_v46 = vpop.f32.mrf.mxu1 }
 0x12d   : > { %v510_v45 = vadd.f32 %v509_v43, %v428_v42  ;;  %v600_v47 = vadd.f32 %v1041_v46, %v517_v41  ;;  %v1048_v48 = vpop.f32.mrf.mxu0 }
 0x12e   : > { %v591_v49 = vpop.f32.mrf.mxu1 }
 0x12f   : > { %v683_v50 = vadd.f32 %v1048_v48, %v600_v47  ;;  %v592_v51 = vadd.f32 %v591_v49, %v510_v45  ;;  %v676_v52 = vpop.f32.mrf.mxu0 }
 0x130   : > { %v1055_v54 = vpop.f32.mrf.mxu1 }
 0x131   : > { %v677_v53 = vadd.f32 %v676_v52, %v592_v51  ;;  %v762_v56 = vadd.f32 %v1055_v54, %v683_v50 }
 0x132   : > { %v755_v57 = vpop.f32.mrf.mxu1 }
 0x133   : > { %v776_v59 = vmul.f32 %v984_v55, %v762_v56  ;;  %v756_v60 = vadd.f32 %v755_v57, %v677_v53 }
 0x135   : > { %v775_v61 = vmul.f32 %v983_v58, %v756_v60  ;;  %v778_v62 = vsel %vm256_vm0, %v776_v59, 0.0 }
 0x137   : > { %v777_v63 = vsel %vm256_vm0, %v775_v61, 0.0 }
 0x138   : > { %v779_v0 = vadd.f32 %v778_v62, %v777_v63 }
 0x13a   : > { %v780_v2 = vrot.slane %v779_v0, 4 }
 0x13c   : > { %v781_v3 = vadd.f32 %v780_v2, %v779_v0 }
 0x13e   : > { %v782_v1 = vrot.slane %v781_v3, 2 }
 0x140   : > { %v783_v4 = vadd.f32 %v782_v1, %v781_v3 }
 0x142   : > { %v784_v5 = vrot.slane %v783_v4, 1 }
 0x144   : > { %v785_v6 = vadd.f32 %v784_v5, %v783_v4 }
 0x146   : > { %787 = vrot.lane.b32.xlu0 %v785_v6, %s1263_s23  ;;  %s235_s23 = scalar_lea.vmem [#allocation7], %s1418_s20 }
 0x147   : > { %s866_s27 = sshll.u32 %s235_s23, 4  ;;  %s867_s27 = int_to_ptr.vmem [resolvable:$true] %s866_s27 }
 0x165   : > { %796 = vadd.xlane.f32.xlu0 %v795_v9 }
 0x1b8   : > { %v788_v11 = vpop.permute.xlu0 %787 }
 0x1b9   : > { %v790_v12 = vsub.f32 %v785_v6, %v788_v11 }
 0x1bb   : > { %v807_v13 = vmul.f32 %v806_v10, %v790_v12  ;;  %v833_v23 = vmul.f32 %v790_v12, %v790_v12 }
 0x1bd   : > { %v809_v14 = vand.u32 2147483647, %v807_v13  ;;  %v808_v21 = vmax.f32 %v807_v13, 0.0  ;;  %v834_v26 = vsel %vm791_vm5, 0.0, %v833_v23 }
 0x1be   : > { %v835_v27 = vsel %vm794_vm6, %v834_v26, 0.0 }
 0x1bf   : > { %v810_v15 = vsub.f32 0.0, %v809_v14 }
 0x1c1   : > { %v811_v17 = vmul.f32 1.442695, %v810_v15 }
 0x1c3   : > { %1123 = vpow2.f32 %v811_v17 }
 0x1d0   : > { %v1124_v18 = vpop.eup %1123 }
 0x1d1   : > { %v813_v19 = vadd.f32 1.0, %v1124_v18 }
 0x1d3   : > { %1125 = vlog2.f32 %v813_v19 }
 0x1e0   : > { %v1126_v20 = vpop.eup %1125 }
 0x1e1   : > { %v815_v22 = vmul.f32 0.6931472, %v1126_v20 }
 0x1e3   : > { %v816_v16 = vadd.f32 %v815_v22, %v808_v21 }
 0x1e5   : > { %v817_v24 = vsel %vm791_vm5, %v816_v16, 0.0 }
 0x1e6   : > { %v818_v25 = vsel %vm794_vm6, %v817_v24, 0.0 }
 0x1e7   : > { %819 = vadd.xlane.f32.xlu1 %v818_v25 }
 0x1eb   : > { %836 = vadd.xlane.f32.xlu1 %v835_v27 }
 0x1ee   : > { %v797_v28 = vpop.xlane.xlu0 %796 }
 0x1ef   : > { %v798_v29 = vrot.slane %v797_v28, 4 }
 0x1f1   : > { %v799_v30 = vadd.f32 %v798_v29, %v797_v28 }
 0x1f3   : > { %v800_v31 = vrot.slane %v799_v30, 2 }
 0x1f5   : > { %v801_v32 = vadd.f32 %v800_v31, %v799_v30 }
 0x1f7   : > { %v802_v33 = vrot.slane %v801_v32, 1 }
 0x1f9   : > { %v803_v34 = vadd.f32 %v802_v33, %v801_v32 }
 0x1fb   : > { %1056 = vpush %v803_v34 }
 0x22c   : > { %s1057_s30 = spop %1056 }
 0x22d   : > { %s805_s5 = ssub.f32 8.0, %s1057_s30  ;;  %s828_s26 = smax.f32 %s1264_s9, %s1057_s30 }
 0x22e   : > { %v829_v35 = vstv %s828_s26  ;;  %s1508_s30 = scalar_lea.hbm %s1548_s3, %s986_s4  ;;  %s1191_s26 = sshll.u32 %s1265_s16, 4  ;;  %s1192_s26 = int_to_ptr.vmem [resolvable:$false] %s1191_s26 }
 0x22f   : > { %s845_s11 = smax.f32 %s1264_s9, %s805_s5  ;;  %1127 = vrcp.f32 %v829_v35  ;;  %s854_s5 = scalar_lea.sflag [#allocation4], %s1418_s20 }
 0x230   : > { %v846_v37 = vstv %s845_s11  ;;  %s1187_s9 = scalar_lea.vmem %s867_s27, 16  ;;  %s1193_s11 = scalar_lea.vmem %s1192_s26, 32 }
 0x231   : > { %1129 = vrcp.f32 %v846_v37  ;;  %p1188_p13 = scmp.ne.s32.totalorder %s867_s27, %s1187_s9  ;;  %p1194_p0 = scmp.lt.s32.totalorder %s867_s27, %s1192_s26 }
 0x232   : > { %p1195_p2 = scmp.lt.s32.totalorder %s1193_s11, %s1187_s9 }
 0x233   : > { %p1189_p8 = pnand %p1188_p13, %p1563_p9 }
 0x234   : > { %p1196_p4 = por %p1195_p2, %p1194_p0 }
 0x235   : > { %p1190_p10 = pneg %p1189_p8 }
 0x237   : > { %p1197_p3 = pnand %p1196_p4, %p1190_p10 }
 0x23c   : > { %v1128_v49 = vpop.eup %1127 }
 0x23e   : > { %v1130_v52 = vpop.eup %1129 }
 0x270   : > { %v820_v36 = vpop.xlane.xlu1 %819 }
 0x271   : > { %v821_v38 = vrot.slane %v820_v36, 4 }
 0x273   : > { %v822_v39 = vadd.f32 %v821_v38, %v820_v36 }
 0x274   : > { %v837_v40 = vpop.xlane.xlu1 %836 }
 0x275   : > { %v823_v41 = vrot.slane %v822_v39, 2  ;;  %v838_v42 = vrot.slane %v837_v40, 4 }
 0x277   : > { %v839_v43 = vadd.f32 %v838_v42, %v837_v40  ;;  %v824_v44 = vadd.f32 %v823_v41, %v822_v39 }
 0x279   : > { %v840_v45 = vrot.slane %v839_v43, 2  ;;  %v825_v46 = vrot.slane %v824_v44, 1 }
 0x27b   : > { %v841_v47 = vadd.f32 %v840_v45, %v839_v43  ;;  %v826_v48 = vadd.f32 %v825_v46, %v824_v44 }
 0x27d   : > { %1058 = vpush %v826_v48  ;;  %v842_v50 = vrot.slane %v841_v47, 1 }
 0x27e   : > { %1060 = vpush %v1128_v49 }
 0x27f   : > { %v843_v51 = vadd.f32 %v842_v50, %v841_v47 }
 0x281   : > { %1062 = vpush %v843_v51 }
 0x282   : > { %1064 = vpush %v1130_v52 }
 0x2ae   : > { %s1059_s17 = spop %1058 }
 0x2af   : > { %s1061_s22 = spop %1060 }
 0x2b0   : > { %s832_s7 = smul.f32 %s1061_s22, %s1059_s17 }
 0x2b2   : > { %s1063_s29 = spop %1062 }
 0x2b3   : > { %s1065_s10 = spop %1064 }
 0x2b4   : > { %s849_s19 = smul.f32 %s1065_s10, %s1063_s29 }
 0x2b6   : > { %s850_s28 = sadd.f32 %s849_s19, %s832_s7 }
 0x2b8   : > { %v851_v53 = vstv %s850_s28 }
 0x2b9   : > { %852 = vst [vmem:[%s235_s23] sm:$0x1] %v851_v53 }
 0x2ba   : > { %1200 = shalt.err (!%p1197_p3)
}
 0x2bb   : > { %s1201_s17 = scalar_lea.hbm %s1508_s30, 16  ;;  %s1205_s29 = scalar_lea.hbm %s1548_s3, 32 }
 0x2bc   : > { %p1202_p5 = scmp.ne.s32.totalorder %s1508_s30, %s1201_s17  ;;  %p1206_p7 = scmp.lt.s32.totalorder %s1508_s30, %s1548_s3 }
 0x2bd   : > { %p1207_p1 = scmp.lt.s32.totalorder %s1205_s29, %s1201_s17 }
 0x2be   : > { %p1203_p11 = pnand %p1202_p5, %p1563_p9 }
 0x2bf   : > { %p1208_p6 = por %p1207_p1, %p1206_p7 }
 0x2c0   : > { %p1204_p12 = pneg %p1203_p11 }
 0x2c2   : > { %p1209_p13 = pnand %p1208_p6, %p1204_p12 }
 0x2c4   : > { %1212 = shalt.err (!%p1209_p13)
}
 0x2c5   : > { %1070 = dma.vmem_to_hbm [thread:$0]  (%p1563_p9), %s867_s27, 16, %s1508_s30, %s854_s5  }
 0x2c6 PF: > { %s878_s10 = sand.u32 1, %s1243_s12   ;;  %p1564_p8 = scmp.ne.s32.totalorder %s1554_s25, 0 }
 0x2c7   : > { %p1565_p10 = scmp.ge.s32.totalorder %s1255_s15, 2  ;;  %s879_s19 = scalar_lea.sflag [#allocation4], %s878_s10 }
 0x2c9   : > { %p1080_p0 = pnand %p1565_p10, %p1564_p8 }
 0x2cb   : > { %p1081_p2 = pneg %p1080_p0 }
 0x2cd   : > { %1238 = dma.done.wait (%p1081_p2), %s879_s19, 16  }
 0x2ce   : > { %1240 = vsyncadd (%p1081_p2), %s879_s19, 4294967280  ;;  %p19_p4 = scmp.ge.s32.totalorder %s1311_s18, 4   ;;  %s1566_s12 = smov %s1247_s13 }
 0x2cf   : > { %s1567_s13 = smov %s1251_s14  ;;  %s1568_s14 = smov %s1323_s21 }
 0x2d0   : > { %s1569_s15 = smov %s1311_s18  ;;  %21 = sbr.rel (!%p19_p4) target bundleno = 7 (0x7), region = 93 }
 0x2d5   :  { %883 = vsyncpa [#allocation3], 1 }
 0x2d6   :  { %885 = vsyncpa [#allocation3 + $0x1], 1 }
 0x2d7   :  { %886 = vsyncpa [#allocation6], 1 }
 0x2d8   :  { %888 = vsyncpa [#allocation6 + $0x1], 1 }
 0x2d9   :  { %889 = vsyncpa [#allocation4], 1 }
 0x2da   :  { %891 = vsyncpa [#allocation4 + $0x1], 1 }

</bundles_post_ra>
